<compile_context>
chip_gen: v7x
topology: tpu7x:2x2x1
jax: 0.10.0
libtpu: 0.0.40
codegen_flags: <defaults>
</compile_context>

<pallas_src>
import functools

import jax
import jax.numpy as jnp
from jax.experimental import pallas as pl
from jax.experimental.pallas import tpu as pltpu

P_DROP = 0.2          # dropout probability (module default)
LANE_WIDTH = 512      # lane-dense last dim (multiple of 128 -> unmasked vst)
MAX_TILE_ROWS = 512   # 512 x 512 f32 block = 1 MiB per buffer


def _mc_dropout_kernel(seed_ref, x_ref, o_ref, *, threshold, scale,
                       tile_rows, lane_width):
    """Elementwise dropout on one (tile_rows, lane_width) VMEM tile."""
    shape = x_ref.shape

    # Global element index of every element in this tile (tiling-invariant).
    row0 = pl.program_id(0) * tile_rows
    row_ids = jax.lax.broadcasted_iota(jnp.int32, shape, 0) + row0
    col_ids = jax.lax.broadcasted_iota(jnp.int32, shape, 1)
    idx = (row_ids * lane_width + col_ids).astype(jnp.uint32)

    # Mix the seed into the counter, then avalanche (lowbias32 hash).
    seed = seed_ref[0].astype(jnp.uint32)
    h = idx ^ (seed * jnp.uint32(0x9E3779B9) + jnp.uint32(0x7F4A7C15))
    h = h ^ (h >> 16)
    h = h * jnp.uint32(0x7FEB352D)
    h = h ^ (h >> 15)
    h = h * jnp.uint32(0x846CA68B)
    h = h ^ (h >> 16)

    # P(drop) = threshold / 2^32 = p  (exact integer-threshold compare).
    keep = h >= jnp.uint32(threshold)

    x = x_ref[...]
    scaled = x * jnp.asarray(scale, dtype=x.dtype)
    o_ref[...] = jnp.where(keep, scaled, jnp.zeros((), dtype=x.dtype))


def mc_dropout(x, seed, p=P_DROP):
    """Apply MC dropout (training-mode nn.Dropout semantics) to `x`."""
    assert 0.0 <= p < 1.0, "dropout probability must be in [0, 1)"
    if p == 0.0:
        return x

    orig_shape = x.shape
    total = x.size
    flat = x.reshape(-1)

    # Lane-dense 2-D slab, padded so the 1-D grid divides evenly.
    rows = -(-total // LANE_WIDTH)              # cdiv
    if rows <= MAX_TILE_ROWS:
        tile_rows = rows                        # single block == full extent
        padded_rows = rows
    else:
        tile_rows = MAX_TILE_ROWS               # multiple of 8
        padded_rows = -(-rows // tile_rows) * tile_rows

    padded_total = padded_rows * LANE_WIDTH
    if padded_total != total:
        flat = jnp.pad(flat, (0, padded_total - total))
    slab = flat.reshape(padded_rows, LANE_WIDTH)
    grid = (padded_rows // tile_rows,)

    threshold = min(int(round(p * 2.0 ** 32)), 2 ** 32 - 1)
    scale = 1.0 / (1.0 - p)

    kernel = functools.partial(
        _mc_dropout_kernel,
        threshold=threshold,
        scale=scale,
        tile_rows=tile_rows,
        lane_width=LANE_WIDTH,
    )

    out_slab = pl.pallas_call(
        kernel,
        out_shape=jax.ShapeDtypeStruct(slab.shape, slab.dtype),
        grid_spec=pltpu.PrefetchScalarGridSpec(
            num_scalar_prefetch=1,              # seed -> SMEM
            grid=grid,
            in_specs=[
                pl.BlockSpec((tile_rows, LANE_WIDTH),
                             lambda i, seed_ref: (i, 0)),
            ],
            out_specs=pl.BlockSpec((tile_rows, LANE_WIDTH),
                                   lambda i, seed_ref: (i, 0)),
        ),
        compiler_params=pltpu.CompilerParams(
            dimension_semantics=("parallel",)),
        cost_estimate=pl.CostEstimate(
            flops=2 * total,
            transcendentals=0,
            bytes_accessed=2 * padded_total * x.dtype.itemsize),
    )(jnp.asarray([seed], dtype=jnp.int32), slab)

    return out_slab.reshape(-1)[:total].reshape(orig_shape)


if __name__ == "__main__":
    key = jax.random.PRNGKey(0)
    # NCHW input, small shapes: batch=2, channels=4, spatial=16x16
    x = jax.random.normal(key, (2, 4, 16, 16), dtype=jnp.float32)

    y = mc_dropout(x, seed=1234, p=P_DROP)
    y = jax.block_until_ready(y)

    # Sanity checks: every output element is either 0 (dropped) or the input
    # scaled by 1/(1-p) (kept); drop rate should be roughly p.
    scale = 1.0 / (1.0 - P_DROP)
    is_zero = jnp.isclose(y, 0.0)
    is_scaled = jnp.isclose(y, x * scale, rtol=1e-5, atol=1e-6)
    assert bool(jnp.all(is_zero | is_scaled)), "output values not {0, x/(1-p)}"
    dropped = is_zero & ~jnp.isclose(x, 0.0)
    drop_frac = float(jnp.mean(dropped.astype(jnp.float32)))
    assert 0.05 < drop_frac < 0.45, f"drop fraction {drop_frac} far from p={P_DROP}"

    print("KERNEL_OK")
</pallas_src>

<mosaic_0001>
module attributes {stable_mosaic.version = 11 : i64} {
  func.func @_mc_dropout_kernel(%arg0: i32, %arg1: memref<1xi32, #tpu.memory_space<smem>>, %arg2: memref<4x512xf32, #tpu.memory_space<vmem>>, %arg3: memref<4x512xf32, #tpu.memory_space<vmem>>) attributes {dimension_semantics = [#tpu.dimension_semantics<parallel>], iteration_bounds = array<i64: 1>, scalar_prefetch = 1 : i64, scratch_operands = 0 : i64, tpu.core_type = #tpu.core_type<tc>, window_params = [{transform_indices = @transform_0, window_bounds = array<i64: 4, 512>}, {transform_indices = @transform_1, window_bounds = array<i64: 4, 512>}]} {
    %c4_i32 = arith.constant 4 : i32
    %0 = arith.muli %arg0, %c4_i32 : i32
    %1 = tpu.iota {dimensions = array<i32: 0>} : vector<4x512xi32>
    %2 = vector.broadcast %0 : i32 to vector<4x512xi32>
    %3 = arith.addi %1, %2 : vector<4x512xi32>
    %4 = tpu.iota {dimensions = array<i32: 1>} : vector<4x512xi32>
    %c512_i32 = arith.constant 512 : i32
    %5 = vector.broadcast %c512_i32 : i32 to vector<4x512xi32>
    %6 = arith.muli %3, %5 : vector<4x512xi32>
    %7 = arith.addi %6, %4 : vector<4x512xi32>
    %c0 = arith.constant 0 : index
    %8 = memref.load %arg1[%c0] : memref<1xi32, #tpu.memory_space<smem>>
    %c-1640531527_i32 = arith.constant -1640531527 : i32
    %9 = arith.muli %8, %c-1640531527_i32 : i32
    %c2135587861_i32 = arith.constant 2135587861 : i32
    %10 = arith.addi %9, %c2135587861_i32 : i32
    %11 = vector.broadcast %10 : i32 to vector<4x512xi32>
    %12 = arith.xori %7, %11 : vector<4x512xi32>
    %c16_i32 = arith.constant 16 : i32
    %13 = vector.broadcast %c16_i32 : i32 to vector<4x512xi32>
    %14 = arith.shrui %12, %13 : vector<4x512xi32>
    %15 = arith.xori %12, %14 : vector<4x512xi32>
    %c2146121005_i32 = arith.constant 2146121005 : i32
    %16 = vector.broadcast %c2146121005_i32 : i32 to vector<4x512xi32>
    %17 = arith.muli %15, %16 : vector<4x512xi32>
    %c15_i32 = arith.constant 15 : i32
    %18 = vector.broadcast %c15_i32 : i32 to vector<4x512xi32>
    %19 = arith.shrui %17, %18 : vector<4x512xi32>
    %20 = arith.xori %17, %19 : vector<4x512xi32>
    %c-2073254261_i32 = arith.constant -2073254261 : i32
    %21 = vector.broadcast %c-2073254261_i32 : i32 to vector<4x512xi32>
    %22 = arith.muli %20, %21 : vector<4x512xi32>
    %c16_i32_0 = arith.constant 16 : i32
    %23 = vector.broadcast %c16_i32_0 : i32 to vector<4x512xi32>
    %24 = arith.shrui %22, %23 : vector<4x512xi32>
    %25 = arith.xori %22, %24 : vector<4x512xi32>
    %c858993459_i32 = arith.constant 858993459 : i32
    %26 = vector.broadcast %c858993459_i32 : i32 to vector<4x512xi32>
    %27 = arith.cmpi uge, %25, %26 : vector<4x512xi32>
    %c0_1 = arith.constant 0 : index
    %c0_2 = arith.constant 0 : index
    %28 = vector.load %arg2[%c0_1, %c0_2] : memref<4x512xf32, #tpu.memory_space<vmem>>, vector<4x512xf32>
    %cst = arith.constant 1.250000e+00 : f32
    %29 = vector.broadcast %cst : f32 to vector<4x512xf32>
    %30 = arith.mulf %28, %29 : vector<4x512xf32>
    %cst_3 = arith.constant 0.000000e+00 : f32
    %31 = vector.broadcast %cst_3 : f32 to vector<4x512xf32>
    %32 = arith.select %27, %30, %31 : vector<4x512xi1>, vector<4x512xf32>
    %c0_4 = arith.constant 0 : index
    %c0_5 = arith.constant 0 : index
    %33 = vector.load %arg3[%c0_4, %c0_5] : memref<4x512xf32, #tpu.memory_space<vmem>>, vector<4x512xf32>
    tpu.vector_store %arg3[%c0_4, %c0_5], %32 {strides = array<i32>} : memref<4x512xf32, #tpu.memory_space<vmem>>, vector<4x512xf32>,
    return
  }
  func.func @transform_0(%arg0: i32, %arg1: memref<1xi32, #tpu.memory_space<smem>>) -> (i32, i32) {
    %c0_i32 = arith.constant 0 : i32
    %c0_i32_0 = arith.constant 0 : i32
    return %arg0, %c0_i32 : i32, i32
  }
  func.func @transform_1(%arg0: i32, %arg1: memref<1xi32, #tpu.memory_space<smem>>) -> (i32, i32) {
    %c0_i32 = arith.constant 0 : i32
    %c0_i32_0 = arith.constant 0 : i32
    return %arg0, %c0_i32 : i32, i32
  }
}

</mosaic_0001>

<bundles_post_ra>
// kernel: tpu_custom_call.1
= control target key start
LH: loop header
LB: loop body
LE: loop exit
PB: predicated region body
PF: predicated region fallthrough
CT: control target
= control target key end

     0   :  { %8 = vsyncpa [#allocation5], 0  ;;  %s215_s0 = inlined_call_operand.<no memory space> [shape: s32[1], index: 0, kind: input, shape index: {}]   ;;  %s216_s1 = inlined_call_operand.hbm [shape: f32[4,512], index: 1, kind: input, shape index: {}]   ;;  %s217_s2 = inlined_call_operand.hbm [shape: f32[4,512], index: 2, kind: output, shape index: {}]  }
   0x1   :  { %9 = vsyncpa [#allocation6], 0  ;;  %s171_s9 = smov [#allocation4]   ;;  %s123_s13 = scalar_lea.hbm %s216_s1, 256 }
   0x2   :  { %s16_s10 = sshll.u32 %s171_s9, 4  ;;  %p124_p0 = scmp.ne.s32.totalorder %s216_s1, %s123_s13  ;;  %s17_s10 = int_to_ptr.vmem [resolvable:$true] %s16_s10 }
   0x3   :  { %p127_p1 = scmp.lt.u32.totalorder %s123_s13, %s216_s1 }
   0x5   :  { %p129_p2 = pnand %p127_p1, %p124_p0 }
   0x7   :  { %132 = shalt.err (!%p129_p2)
}
   0x8   :  { %s133_s18 = scalar_lea.vmem %s17_s10, 256  ;;  %p138_p4 = scmp.lt.s32.totalorder %s17_s10, %s17_s10 }
   0x9   :  { %p134_p3 = scmp.ne.s32.totalorder %s17_s10, %s133_s18  ;;  %p139_p5 = scmp.lt.s32.totalorder %s133_s18, %s133_s18 }
   0xb   :  { %p140_p6 = por %p139_p5, %p138_p4 }
   0xd   :  { %p141_p7 = pnand %p140_p6, %p134_p3 }
   0xf   :  { %144 = shalt.err (!%p141_p7)
}
  0x10   :  { %19 = dma.hbm_to_vmem [thread:$0]  %s216_s1, 256, %s17_s10, [#allocation5]  }
  0x11   :  { %167 = dma.done.wait [#allocation5], 256  }
  0x12   :  { %168 = vsyncadd [#allocation5], 4294967040  ;;  %v24_v0 = vlaneseq  ;;  %s39_s23 = smul.u32 2654435769, %s215_s0  ;;  %v82_v30 = vld [vmem:[#allocation4] sm:$0xff]  ;;  %v83_v33 = vld [vmem:[#allocation4 + $0x8] sm:$0xff] }
  0x13   :  { %v84_v36 = vmul.f32 1.25, %v82_v30  ;;  %v85_v41 = vmul.f32 1.25, %v83_v33  ;;  %s172_s0 = smov [#allocation7]  }
  0x14   :  { %v25_v1 = vshrl.u32 %v24_v0, 7  ;;  %v29_v2 = vand.u32 127, %v24_v0  ;;  %s40_s24 = sadd.s32 2135587861, %s39_s23  ;;  %s112_s1 = sshll.u32 %s172_s0, 4  ;;  %s113_s1 = int_to_ptr.vmem [resolvable:$true] %s112_s1 }
  0x15   :  { %v41_v7 = vstv %s40_s24  ;;  %v88_v46 = vcombine.high %v84_v36, %v84_v36  ;;  %v89_v51 = vcombine.high %v85_v41, %v85_v41  ;;  %s145_s25 = scalar_lea.vmem %s113_s1, 256  ;;  %p150_p9 = scmp.lt.s32.totalorder %s113_s1, %s113_s1 }
  0x16   :  { %v30_v3 = vadd.s32 128, %v29_v2  ;;  %v33_v4 = vmul.u32 512, %v25_v1  ;;  %v31_v5 = vadd.s32 256, %v29_v2  ;;  %v32_v6 = vadd.s32 384, %v29_v2  ;;  %p146_p8 = scmp.ne.s32.totalorder %s113_s1, %s145_s25  ;;  %p151_p10 = scmp.lt.s32.totalorder %s145_s25, %s145_s25 }
  0x18   :  { %v34_v8 = vadd.s32 %v33_v4, %v29_v2  ;;  %v35_v9 = vadd.s32 %v33_v4, %v30_v3  ;;  %v36_v10 = vadd.s32 %v33_v4, %v31_v5  ;;  %v37_v11 = vadd.s32 %v33_v4, %v32_v6  ;;  %p152_p11 = por %p151_p10, %p150_p9 }
  0x1a   :  { %v42_v12 = vxor.u32 %v41_v7, %v34_v8  ;;  %v43_v13 = vxor.u32 %v41_v7, %v35_v9  ;;  %v44_v14 = vxor.u32 %v41_v7, %v36_v10  ;;  %v45_v15 = vxor.u32 %v41_v7, %v37_v11  ;;  %p153_p12 = pnand %p152_p11, %p146_p8 }
  0x1c   :  { %v46_v16 = vshrl.u32 %v42_v12, 16  ;;  %v47_v17 = vshrl.u32 %v43_v13, 16  ;;  %v48_v18 = vshrl.u32 %v44_v14, 16  ;;  %v49_v19 = vshrl.u32 %v45_v15, 16 }
  0x1e   :  { %v50_v20 = vxor.u32 %v46_v16, %v42_v12  ;;  %v51_v21 = vxor.u32 %v47_v17, %v43_v13  ;;  %v52_v22 = vxor.u32 %v48_v18, %v44_v14  ;;  %v53_v23 = vxor.u32 %v49_v19, %v45_v15 }
  0x20   :  { %v54_v24 = vmul.u32 2146121005, %v50_v20  ;;  %v55_v25 = vmul.u32 2146121005, %v51_v21 }
  0x21   :  { %v56_v26 = vmul.u32 2146121005, %v52_v22  ;;  %v57_v27 = vmul.u32 2146121005, %v53_v23 }
  0x22   :  { %v58_v28 = vshrl.u32 %v54_v24, 15  ;;  %v59_v29 = vshrl.u32 %v55_v25, 15 }
  0x23   :  { %v60_v31 = vshrl.u32 %v56_v26, 15  ;;  %v61_v32 = vshrl.u32 %v57_v27, 15 }
  0x24   :  { %v62_v34 = vxor.u32 %v58_v28, %v54_v24  ;;  %v63_v35 = vxor.u32 %v59_v29, %v55_v25 }
  0x25   :  { %v64_v37 = vxor.u32 %v60_v31, %v56_v26  ;;  %v65_v38 = vxor.u32 %v61_v32, %v57_v27 }
  0x26   :  { %v66_v39 = vmul.u32 2221713035, %v62_v34  ;;  %v67_v40 = vmul.u32 2221713035, %v63_v35 }
  0x27   :  { %v68_v42 = vmul.u32 2221713035, %v64_v37  ;;  %v69_v43 = vmul.u32 2221713035, %v65_v38 }
  0x28   :  { %v70_v44 = vshrl.u32 %v66_v39, 16  ;;  %v71_v45 = vshrl.u32 %v67_v40, 16 }
  0x29   :  { %v72_v47 = vshrl.u32 %v68_v42, 16  ;;  %v73_v48 = vshrl.u32 %v69_v43, 16 }
  0x2a   :  { %v74_v49 = vxor.u32 %v70_v44, %v66_v39  ;;  %v75_v50 = vxor.u32 %v71_v45, %v67_v40 }
  0x2b   :  { %v76_v52 = vxor.u32 %v72_v47, %v68_v42  ;;  %v77_v53 = vxor.u32 %v73_v48, %v69_v43 }
  0x2c   :  { %vm78_vm0 = vcmp.ge.u32.totalorder %v74_v49, 858993459  ;;  %vm79_vm1 = vcmp.ge.u32.totalorder %v75_v50, 858993459 }
  0x2d   :  { %v92_v54 = vsel %vm78_vm0, %v84_v36, 0.0  ;;  %v93_v55 = vsel %vm79_vm1, %v88_v46, 0.0  ;;  %vm80_vm2 = vcmp.ge.u32.totalorder %v76_v52, 858993459  ;;  %vm81_vm3 = vcmp.ge.u32.totalorder %v77_v53, 858993459 }
  0x2e   :  { %v100_v56 = vcombine.low %v92_v54, %v93_v55  ;;  %v94_v57 = vsel %vm80_vm2, %v85_v41, 0.0  ;;  %v95_v58 = vsel %vm81_vm3, %v89_v51, 0.0 }
  0x2f   :  { %v101_v59 = vcombine.low %v94_v57, %v95_v58 }
  0x30   :  { %104 = vst [vmem:[#allocation7] sm:$0xff] %v100_v56 }
  0x31   :  { %105 = vst [vmem:[#allocation7 + $0x8] sm:$0xff] %v101_v59 }
  0x32   :  { %156 = shalt.err (!%p153_p12)
}
  0x33   :  { %s157_s28 = scalar_lea.hbm %s217_s2, 256 }
  0x34   :  { %p158_p13 = scmp.ne.s32.totalorder %s217_s2, %s157_s28  ;;  %p161_p0 = scmp.lt.u32.totalorder %s157_s28, %s217_s2 }
  0x36   :  { %p163_p1 = pnand %p161_p0, %p158_p13 }
  0x38   :  { %166 = shalt.err (!%p163_p1)
}
  0x39   :  { %115 = dma.vmem_to_hbm [thread:$0]  %s113_s1, 256, %s217_s2, [#allocation6]  }
  0x3a   :  { %169 = dma.done.wait [#allocation6], 256  }
  0x3b   :  { %170 = vsyncadd [#allocation6], 4294967040 }
  0x3c   :  { %119 = vsyncpa [#allocation5], 1 }
  0x3d   :  { %120 = vsyncpa [#allocation6], 1 }

</bundles_post_ra>
